<compile_context>
chip_gen: v6e
topology: v6e:2x2x1
jax: 0.10.0
libtpu: 0.0.40
codegen_flags: <defaults>
</compile_context>

<pallas_src>
import math
import functools

import jax
import jax.numpy as jnp
from jax import lax
from jax.experimental import pallas as pl
from jax.experimental.pallas import tpu as pltpu


def _pe_kernel(invf_ref, jvec_ref, phase_ref, o_ref, *, tile_rows: int, pack: int):
    """Writes one (tile_rows, W) block of the lane-packed PE table.

    Lane l encodes feature c = l % d_model of position p = row*pack + l//d_model:
      invf_ref[0, l]  = exp(-(c - c%2) * ln(10000)/d_model)
      jvec_ref[0, l]  = float(l // d_model)      (packed sub-position)
      phase_ref[0, l] = (c % 2) * pi/2           (cos(x) == sin(x + pi/2))
    """
    base = pl.program_id(0) * tile_rows
    # int32 iota + cast (safe Mosaic pattern), (tile_rows, 1) column vector.
    row = (lax.broadcasted_iota(jnp.int32, (tile_rows, 1), 0) + base).astype(jnp.float32)
    # p = row*pack + j is an exact small integer in f32, matching the reference
    # rounding of position * div_term as closely as possible.
    p = row * float(pack) + jvec_ref[...]                # (tile_rows, W)
    angle = p * invf_ref[...] + phase_ref[...]           # (tile_rows, W)
    o_ref[...] = jnp.sin(angle)                          # single transcendental / elem


def _pack_factor(d_model: int, max_len: int) -> int:
    """Number of positions packed per output row to make lanes dense."""
    if d_model >= 128 or (128 % d_model) != 0:
        return 1
    k = 128 // d_model
    while k > 1 and (max_len % k) != 0:
        k //= 2
    return k


def _pick_tile_rows(rows: int, width: int) -> int:
    """Pick block rows: <= ~4 MiB per f32 block, grid >= 2 when possible."""
    if rows <= 8:
        return rows
    budget = max(8, (4 << 20) // (4 * width))            # ~4 MiB per block
    half = max(8, (pl.cdiv(rows, 2) // 8) * 8)           # -> at least 2 grid steps
    ts = min(budget, half, 512)
    return max(8, (ts // 8) * 8)


def _build_pe_table(d_model: int, max_len: int = 512) -> jax.Array:
    """Builds the full (1, max_len, d_model) float32 table with one Pallas call."""
    pack = _pack_factor(d_model, max_len)
    width = pack * d_model
    rows = max_len // pack

    # Per-lane constants, computed once in plain JAX (hoisted out of the kernel).
    lane = jnp.arange(width, dtype=jnp.int32)
    c = lane % d_model
    j = lane // d_model
    invf = jnp.exp((c - (c % 2)).astype(jnp.float32)
                   * jnp.float32(-(math.log(10000.0) / d_model)))[None, :]
    jvec = j.astype(jnp.float32)[None, :]
    phase = ((c % 2).astype(jnp.float32) * jnp.float32(0.5 * math.pi))[None, :]

    tile_rows = _pick_tile_rows(rows, width)
    grid = (pl.cdiv(rows, tile_rows),)
    kernel = functools.partial(_pe_kernel, tile_rows=tile_rows, pack=pack)

    row_spec = pl.BlockSpec((1, width), lambda i: (0, 0))   # VMEM-resident constants
    packed = pl.pallas_call(
        kernel,
        out_shape=jax.ShapeDtypeStruct((rows, width), jnp.float32),
        grid=grid,
        in_specs=[row_spec, row_spec, row_spec],
        out_specs=pl.BlockSpec((tile_rows, width), lambda i: (i, 0)),
        compiler_params=pltpu.CompilerParams(
            dimension_semantics=("parallel",),
        ),
    )(invf, jvec, phase)

    # Row-major reshape undoes the lane packing: packed[r, j*d + c] == pe[r*pack + j, c].
    return packed.reshape(max_len, d_model)[None, :, :]


class PositionalEncoding:
    """Pallas-backed equivalent of the PyTorch module: the sinusoidal buffer is
    built once here (like register_buffer); __call__ is a pure slice and never
    re-runs the kernel."""

    def __init__(self, d_model: int, max_len: int = 512):
        self.d_model = d_model
        self.max_len = max_len
        self.pe = jax.block_until_ready(_build_pe_table(d_model, max_len))

    def __call__(self, x: jax.Array) -> jax.Array:
        # forward(x) -> pe[:, :x.size(1)]  (float32, batch dim of 1)
        return self.pe[:, : x.shape[1]]


def _reference_pe(seq_len: int, d_model: int) -> jnp.ndarray:
    # Pure-JAX reference mirroring the PyTorch buffer construction.
    position = jnp.arange(seq_len, dtype=jnp.float32)[:, None]
    div_term = jnp.exp(
        jnp.arange(0, d_model, 2, dtype=jnp.float32)
        * -(math.log(10000.0) / d_model)
    )
    pe = jnp.zeros((seq_len, d_model), dtype=jnp.float32)
    pe = pe.at[:, 0::2].set(jnp.sin(position * div_term))
    pe = pe.at[:, 1::2].set(jnp.cos(position * div_term))
    return pe[None, :, :]


if __name__ == "__main__":
    key = jax.random.PRNGKey(0)
    batch, seq, d_model, max_len = 2, 8, 32, 512
    x = jax.random.normal(key, (batch, seq, d_model), dtype=jnp.float32)

    module = PositionalEncoding(d_model, max_len=max_len)   # kernel runs once here

    out = jax.block_until_ready(module(x))
    ref = _reference_pe(seq, d_model)
    assert out.shape == (1, seq, d_model), out.shape
    assert out.dtype == jnp.float32, out.dtype
    assert jnp.allclose(out, ref, atol=1e-5, rtol=1e-5), "mismatch vs reference"

    # Second forward is a pure slice of the cached buffer (no kernel launch).
    out2 = jax.block_until_ready(module(x))
    assert jnp.allclose(out2, ref, atol=1e-5, rtol=1e-5)

    # Loose full-table sanity check (ULP-level drift from cos(x)=sin(x+pi/2)).
    full_ref = _reference_pe(max_len, d_model)
    assert jnp.allclose(module.pe, full_ref, atol=5e-4, rtol=5e-4)

    print("KERNEL_OK")
</pallas_src>

<mosaic_0001>
module attributes {stable_mosaic.version = 11 : i64} {
  func.func @_pe_kernel(%arg0: i32, %arg1: memref<1x128xf32, #tpu.memory_space<vmem>>, %arg2: memref<1x128xf32, #tpu.memory_space<vmem>>, %arg3: memref<1x128xf32, #tpu.memory_space<vmem>>, %arg4: memref<64x128xf32, #tpu.memory_space<vmem>>) attributes {dimension_semantics = [#tpu.dimension_semantics<parallel>], iteration_bounds = array<i64: 2>, scalar_prefetch = 0 : i64, scratch_operands = 0 : i64, tpu.core_type = #tpu.core_type<tc>, window_params = [{pipeline_mode = #tpu.pipeline_mode<synchronous>, transform_indices = @transform_0, window_bounds = array<i64: 1, 128>}, {pipeline_mode = #tpu.pipeline_mode<synchronous>, transform_indices = @transform_1, window_bounds = array<i64: 1, 128>}, {pipeline_mode = #tpu.pipeline_mode<synchronous>, transform_indices = @transform_2, window_bounds = array<i64: 1, 128>}, {transform_indices = @transform_3, window_bounds = array<i64: 64, 128>}]} {
    %c64_i32 = arith.constant 64 : i32
    %0 = arith.muli %arg0, %c64_i32 : i32
    %1 = tpu.iota {dimensions = array<i32: 0>} : vector<64x1xi32>
    %2 = vector.broadcast %0 : i32 to vector<64x1xi32>
    %3 = arith.addi %1, %2 : vector<64x1xi32>
    %4 = arith.sitofp %3 : vector<64x1xi32> to vector<64x1xf32>
    %cst = arith.constant 4.000000e+00 : f32
    %5 = vector.broadcast %cst : f32 to vector<64x1xf32>
    %6 = arith.mulf %4, %5 : vector<64x1xf32>
    %c0 = arith.constant 0 : index
    %c0_0 = arith.constant 0 : index
    %7 = vector.load %arg2[%c0, %c0_0] : memref<1x128xf32, #tpu.memory_space<vmem>>, vector<1x128xf32>
    %8 = vector.broadcast %6 : vector<64x1xf32> to vector<64x128xf32>
    %9 = vector.broadcast %7 : vector<1x128xf32> to vector<64x128xf32>
    %10 = arith.addf %8, %9 : vector<64x128xf32>
    %c0_1 = arith.constant 0 : index
    %c0_2 = arith.constant 0 : index
    %11 = vector.load %arg1[%c0_1, %c0_2] : memref<1x128xf32, #tpu.memory_space<vmem>>, vector<1x128xf32>
    %12 = vector.broadcast %11 : vector<1x128xf32> to vector<64x128xf32>
    %13 = arith.mulf %10, %12 : vector<64x128xf32>
    %c0_3 = arith.constant 0 : index
    %c0_4 = arith.constant 0 : index
    %14 = vector.load %arg3[%c0_3, %c0_4] : memref<1x128xf32, #tpu.memory_space<vmem>>, vector<1x128xf32>
    %15 = vector.broadcast %14 : vector<1x128xf32> to vector<64x128xf32>
    %16 = arith.addf %13, %15 : vector<64x128xf32>
    %17 = math.sin %16 : vector<64x128xf32>
    %c0_5 = arith.constant 0 : index
    %c0_6 = arith.constant 0 : index
    %18 = vector.load %arg4[%c0_5, %c0_6] : memref<64x128xf32, #tpu.memory_space<vmem>>, vector<64x128xf32>
    tpu.vector_store %arg4[%c0_5, %c0_6], %17 {strides = array<i32>} : memref<64x128xf32, #tpu.memory_space<vmem>>, vector<64x128xf32>,
    return
  }
  func.func @transform_0(%arg0: i32) -> (i32, i32) {
    %c0_i32 = arith.constant 0 : i32
    %c0_i32_0 = arith.constant 0 : i32
    %c0_i32_1 = arith.constant 0 : i32
    return %c0_i32, %c0_i32_0 : i32, i32
  }
  func.func @transform_1(%arg0: i32) -> (i32, i32) {
    %c0_i32 = arith.constant 0 : i32
    %c0_i32_0 = arith.constant 0 : i32
    %c0_i32_1 = arith.constant 0 : i32
    return %c0_i32, %c0_i32_0 : i32, i32
  }
  func.func @transform_2(%arg0: i32) -> (i32, i32) {
    %c0_i32 = arith.constant 0 : i32
    %c0_i32_0 = arith.constant 0 : i32
    %c0_i32_1 = arith.constant 0 : i32
    return %c0_i32, %c0_i32_0 : i32, i32
  }
  func.func @transform_3(%arg0: i32) -> (i32, i32) {
    %c0_i32 = arith.constant 0 : i32
    %c0_i32_0 = arith.constant 0 : i32
    return %arg0, %c0_i32 : i32, i32
  }
}

</mosaic_0001>

<bundles_post_ra>
// kernel: tpu_custom_call.1
= control target key start
LH: loop header
LB: loop body
LE: loop exit
PB: predicated region body
PF: predicated region fallthrough
CT: control target
= control target key end

     0   :  { %8 = vsyncpa [#allocation3], 0  ;;  %s2165_s0 = inlined_call_operand.hbm [shape: f32[1,128], index: 0, kind: input, shape index: {}]   ;;  %s2166_s1 = inlined_call_operand.vmem [shape: f32[1,128], index: 1, kind: input, shape index: {}]   ;;  %s2167_s2 = inlined_call_operand.vmem [shape: f32[1,128], index: 2, kind: input, shape index: {}]   ;;  %s2168_s3 = inlined_call_operand.hbm [shape: f32[128,128], index: 3, kind: output, shape index: {}]  }
   0x1   :  { %9 = vsyncpa [#allocation4], 0 }
   0x2   :  { %11 = vsyncpa [#allocation4 + $0x1], 0  ;;  %s1451_s12 = smov 0   ;;  %s1453_s13 = smov 0  }
   0x3   :  { %s1455_s14 = smov 0   ;;  %s1457_s15 = smov 0  }
   0x4 LB: > { %s1472_s16 = sadd.s32 4294967295, %s1419_s15   ;;  %s1159_s17 = sadd.s32 4294967294, %s1419_s15   ;;  %s1419_s15 = sphi %s1457_s15, %s2187_s15   ;;  %s1415_s14 = sphi %s1455_s14, %s2186_s14   ;;  %s1411_s13 = sphi %s1453_s13, %s2185_s13   ;;  %s1407_s12 = sphi %s1451_s12, %s2184_s12  }
   0x5   : > { %s1476_s18 = sadd.s32 1, %s1419_s15   ;;  %s87_s19 = sadd.s32 1, %s1415_s14 }
   0x6   : > { %s84_s20 = ssub.s32 %s1419_s15, %s1476_s18  ;;  %p97_p0 = scmp.ne.s32.totalorder %s1415_s14, %s1411_s13 }
   0x7   : > { %p85_p1 = scmp.eq.s32.totalorder %s84_s20, 0  ;;  %p98_p2 = scmp.eq.s32.totalorder %s1472_s16, 1 }
   0x8   : > { %p103_p3 = scmp.ne.s32.totalorder %s1411_s13, %s1407_s12  ;;  %p104_p4 = scmp.eq.s32.totalorder %s1159_s17, 1 }
   0x9   : > { %s1487_s21 = scalar_select %p85_p1, %s1415_s14, %s87_s19  }
   0xa   : > { %p1489_p5 = por %p98_p2, %p97_p0  ;;  %p1493_p6 = por %p104_p4, %p103_p3 }
   0xb   : > { %p1160_p7 = scmp.ge.s32.totalorder %s1419_s15, 1  ;;  %p111_p8 = scmp.lt.s32.totalorder %s1419_s15, 3 }
   0xc   : > { %p1253_p9 = scmp.eq.s32.totalorder %s1472_s16, 0  ;;  %s1421_s25 = smov [#allocation2]  }
   0xd   : > { %p1500_p10 = pnand %p1160_p7, %p111_p8  ;;  %s124_s26 = sshll.u32 %s1421_s25, 4  ;;  %s125_s26 = int_to_ptr.vmem [resolvable:$true] %s124_s26 }
   0xe   : > { %s1340_s27 = scalar_lea.vmem %s125_s26, 16  ;;  %s1347_s28 = scalar_lea.vmem %s125_s26, 32 }
   0xf   : > { %p1245_p11 = pneg %p1500_p10  ;;  %p1341_p0 = scmp.ne.s32.totalorder %s125_s26, %s1340_s27 }
  0x10   : > { %p1348_p3 = scmp.lt.s32.totalorder %s125_s26, %s125_s26  ;;  %p1349_p4 = scmp.lt.s32.totalorder %s1347_s28, %s1340_s27 }
  0x11   : > { %p1246_p12 = pnand %p1253_p9, %p1245_p11 }
  0x12   : > { %p1350_p7 = por %p1349_p4, %p1348_p3 }
  0x13   : > { %p1331_p13 = pneg %p1246_p12 }
  0x15   : > { %p1343_p1 = pnand %p1341_p0, %p1331_p13 }
  0x17   : > { %p1344_p2 = pneg %p1343_p1 }
  0x19   : > { %p1351_p8 = pnand %p1350_p7, %p1344_p2 }
  0x1b   : > { %1354 = shalt.err (!%p1351_p8)
}
  0x1c   : > { %1248 = dma.hbm_to_vmem [thread:$0]  (!%p1246_p12), %s2165_s0, 16, %s125_s26, [#allocation3]  }
  0x1d   : > { %143 = sbr.rel (%p1500_p10) target bundleno = 304 (0x130), region = 32 }
  0x22   : > { %1398 = dma.done.wait (%p1253_p9), [#allocation3], 16  }
  0x23   : > { %1400 = vsyncadd (%p1253_p9), [#allocation3], 4294967280  ;;  %s1165_s4 = sshll.u32 %s1472_s16, 6  ;;  %v164_v0 = vlaneseq  ;;  %v1166_v22 = vld [vmem:[%s2166_s1] ss:$0 sm:$0xff]  ;;  %s159_s9 = sand.u32 1, %s1411_s13  }
  0x24   : > { %v173_v2 = vstv %s1165_s4  ;;  %v1167_v31 = vld [vmem:[#allocation2] ss:$0 sm:$0xff]  ;;  %s1164_s10 = sshll.u32 %s159_s9, 6  ;;  %s1206_s17 = sshll.u32 %s1472_s16, 10 }
  0x25   : > { %v165_v1 = vshrl.u32 %v164_v0, 7  ;;  %v1168_v39 = vld [vmem:[%s2167_s2] ss:$0 sm:$0xff]  ;;  %s1837_s11 = scalar_lea.vmem [#allocation5], %s1164_s10  ;;  %s2118_s25 = scalar_lea.hbm %s2168_s3, %s1206_s17 }
  0x26   : > { %s1097_s19 = sshll.u32 %s1837_s11, 4  ;;  %s2125_s16 = scalar_lea.sflag [#allocation4], %s159_s9  ;;  %s2120_s19 = int_to_ptr.vmem [resolvable:$true] %s1097_s19 }
  0x27   : > { %v166_v3 = vadd.s32 8, %v165_v1  ;;  %v167_v4 = vadd.s32 16, %v165_v1  ;;  %v168_v5 = vadd.s32 24, %v165_v1  ;;  %v169_v6 = vadd.s32 32, %v165_v1  ;;  %s1355_s26 = scalar_lea.vmem %s2120_s19, 1024  ;;  %s1428_s27 = smov [#allocation5]  }
  0x28   : > { %v170_v7 = vadd.s32 40, %v165_v1  ;;  %v171_v8 = vadd.s32 48, %v165_v1  ;;  %v172_v9 = vadd.s32 56, %v165_v1  ;;  %v174_v10 = vadd.s32 %v173_v2, %v165_v1  ;;  %p1356_p9 = scmp.ne.s32.totalorder %s2120_s19, %s1355_s26  ;;  %s1359_s28 = sshll.u32 %s1428_s27, 4  ;;  %s1360_s28 = int_to_ptr.vmem [resolvable:$false] %s1359_s28 }
  0x29   : > { %v175_v11 = vadd.s32 %v173_v2, %v166_v3  ;;  %v176_v12 = vadd.s32 %v173_v2, %v167_v4  ;;  %v177_v13 = vadd.s32 %v173_v2, %v168_v5  ;;  %v178_v14 = vadd.s32 %v173_v2, %v169_v6  ;;  %s1361_s29 = scalar_lea.vmem %s1360_s28, 2048  ;;  %p1362_p12 = scmp.lt.s32.totalorder %s2120_s19, %s1360_s28 }
  0x2a   : > { %v179_v15 = vadd.s32 %v173_v2, %v170_v7  ;;  %v180_v16 = vadd.s32 %v173_v2, %v171_v8  ;;  %v181_v17 = vadd.s32 %v173_v2, %v172_v9  ;;  %v182_v18 = vcvt.s32.f32 %v174_v10  ;;  %p1357_p10 = pnand %p1356_p9, %p1489_p5  ;;  %p1363_p13 = scmp.lt.s32.totalorder %s1361_s29, %s1355_s26 }
  0x2b   : > { %v183_v19 = vcvt.s32.f32 %v175_v11  ;;  %v184_v20 = vcvt.s32.f32 %v176_v12  ;;  %v186_v21 = vcvt.s32.f32 %v178_v14  ;;  %v185_v27 = vcvt.s32.f32 %v177_v13 }
  0x2c   : > { %v187_v23 = vcvt.s32.f32 %v179_v15  ;;  %v188_v24 = vcvt.s32.f32 %v180_v16  ;;  %v189_v25 = vcvt.s32.f32 %v181_v17  ;;  %v190_v26 = vmul.f32 4.0, %v182_v18  ;;  %p1358_p11 = pneg %p1357_p10  ;;  %p1364_p0 = por %p1363_p13, %p1362_p12 }
  0x2d   : > { %v191_v28 = vmul.f32 4.0, %v183_v19  ;;  %v192_v29 = vmul.f32 4.0, %v184_v20  ;;  %v194_v30 = vmul.f32 4.0, %v186_v21  ;;  %v193_v44 = vmul.f32 4.0, %v185_v27 }
  0x2e   : > { %v195_v32 = vmul.f32 4.0, %v187_v23  ;;  %v196_v33 = vmul.f32 4.0, %v188_v24  ;;  %v197_v34 = vmul.f32 4.0, %v189_v25  ;;  %v205_v35 = vadd.f32 %v1166_v22, %v190_v26  ;;  %p1365_p1 = pnand %p1364_p0, %p1358_p11 }
  0x2f   : > { %v206_v36 = vadd.f32 %v1166_v22, %v191_v28  ;;  %v207_v37 = vadd.f32 %v1166_v22, %v192_v29  ;;  %v209_v38 = vadd.f32 %v1166_v22, %v194_v30  ;;  %v208_v61 = vadd.f32 %v1166_v22, %v193_v44 }
  0x30   : > { %v210_v40 = vadd.f32 %v1166_v22, %v195_v32  ;;  %v211_v41 = vadd.f32 %v1166_v22, %v196_v33  ;;  %v212_v42 = vadd.f32 %v1166_v22, %v197_v34  ;;  %v220_v43 = vmul.f32 %v1167_v31, %v205_v35 }
  0x31   : > { %v221_v45 = vmul.f32 %v1167_v31, %v206_v36  ;;  %v222_v46 = vmul.f32 %v1167_v31, %v207_v37  ;;  %v224_v47 = vmul.f32 %v1167_v31, %v209_v38  ;;  %v223_v5 = vmul.f32 %v1167_v31, %v208_v61 }
  0x32   : > { %v225_v48 = vmul.f32 %v1167_v31, %v210_v40  ;;  %v226_v49 = vmul.f32 %v1167_v31, %v211_v41  ;;  %v227_v50 = vmul.f32 %v1167_v31, %v212_v42  ;;  %v1524_v51 = vadd.f32 %v1168_v39, %v220_v43 }
  0x33   : > { %v1526_v52 = vadd.f32 %v1168_v39, %v221_v45  ;;  %v1528_v53 = vadd.f32 %v1168_v39, %v224_v47  ;;  %v1537_v58 = vadd.f32 %v1168_v39, %v222_v46  ;;  %v1547_v13 = vadd.f32 %v1168_v39, %v223_v5 }
  0x34   : > { %v1530_v54 = vadd.f32 %v1168_v39, %v225_v48  ;;  %v1532_v55 = vadd.f32 %v1168_v39, %v226_v49  ;;  %v1534_v56 = vadd.f32 %v1168_v39, %v227_v50  ;;  %v243_v57 = vand.u32 2147483647, %v1524_v51 }
  0x35   : > { %v246_v59 = vand.u32 2139095040, %v1524_v51  ;;  %v347_v60 = vand.u32 2147483647, %v1526_v52  ;;  %v350_v62 = vand.u32 2139095040, %v1526_v52  ;;  %v454_v4 = vand.u32 2139095040, %v1537_v58 }
  0x36   : > { %v250_v0 = vand.u32 8388607, %v243_v57  ;;  %v451_v18 = vand.u32 2147483647, %v1537_v58  ;;  %v1422_v24 = vmov 683565275  }
  0x37   : > { %v247_v63 = vshrl.u32 %v246_v59, 23  ;;  %v351_v1 = vshrl.u32 %v350_v62, 23  ;;  %v354_v2 = vand.u32 8388607, %v347_v60  ;;  %v455_v8 = vshrl.u32 %v454_v4, 23 }
  0x38   : > { %v251_v9 = vor.u32 8388608, %v250_v0  ;;  %v1423_v26 = vmov 2475754826   ;;  %v1424_v28 = vmov 2131351028   ;;  %vm245_vm13 = vcmp.lt.s32.totalorder %v1524_v51, 0 }
  0x39   : > { %v1169_v3 = vadd.s32 4294967169, %v247_v63  ;;  %v1173_v6 = vadd.s32 4294967169, %v351_v1  ;;  %v355_v10 = vor.u32 8388608, %v354_v2  ;;  %v1177_v12 = vadd.s32 4294967169, %v455_v8 }
  0x3a   : > { %v1550_v19 = vshll.u32 %v251_v9, 8  ;;  %v1425_v30 = vmov 2102212464   ;;  %v1426_v32 = vmov 920167782  }
  0x3b   : > { %v253_v7 = vadd.s32 1, %v1169_v3  ;;  %v357_v11 = vadd.s32 1, %v1173_v6  ;;  %v1552_v21 = vshll.u32 %v355_v10, 8  ;;  %v1554_v22 = vadd.s32 1, %v1177_v12 }
  0x3c   : > { %v1427_v40 = vmov 1326507024   ;;  %vm1655_vm14 = vcmp.le.f32.partialorder %v243_v57, 0.7853982 }
  0x3d   : > { %vm254_vm0 = vcmp.gt.s32.totalorder %v253_v7, 0  ;;  %vm358_vm1 = vcmp.gt.s32.totalorder %v357_v11, 0  ;;  %vm462_vm11 = vcmp.gt.s32.totalorder %v1554_v22, 0 }
  0x3e   : > { %v255_v14 = vsel %vm254_vm0, %v253_v7, 0  ;;  %v359_v17 = vsel %vm358_vm1, %v357_v11, 0 }
  0x3f   : > { %v256_v15 = vshrl.u32 %v255_v14, 5  ;;  %v257_v16 = vand.u32 31, %v255_v14  ;;  %v361_v20 = vand.u32 31, %v359_v17  ;;  %v1561_v34 = vshrl.u32 %v359_v17, 5 }
  0x41   : > { %v258_v23 = vsub.s32 32, %v257_v16  ;;  %v260_v25 = vshll.u32 %v1422_v24, %v257_v16  ;;  %v263_v27 = vshll.u32 %v1423_v26, %v257_v16  ;;  %v266_v29 = vshll.u32 %v1424_v28, %v257_v16 }
  0x42   : > { %v269_v31 = vshll.u32 %v1425_v30, %v257_v16  ;;  %v272_v33 = vshll.u32 %v1426_v32, %v257_v16  ;;  %vm275_vm2 = vcmp.lt.s32.totalorder %v256_v15, 1  ;;  %vm276_vm3 = vcmp.lt.s32.totalorder %v256_v15, 2 }
  0x43   : > { %v259_v35 = vshrl.u32 %v1422_v24, %v258_v23  ;;  %v261_v36 = vshrl.u32 %v1423_v26, %v258_v23  ;;  %v264_v37 = vshrl.u32 %v1424_v28, %v258_v23  ;;  %v267_v38 = vshrl.u32 %v1425_v30, %v258_v23 }
  0x44   : > { %v270_v39 = vshrl.u32 %v1426_v32, %v258_v23  ;;  %v273_v41 = vshrl.u32 %v1427_v40, %v258_v23  ;;  %vm278_vm4 = vcmp.lt.s32.totalorder %v256_v15, 4  ;;  %v362_v45 = vsub.s32 32, %v361_v20 }
  0x45   : > { %v262_v42 = vor.u32 %v261_v36, %v260_v25  ;;  %v265_v43 = vor.u32 %v264_v37, %v263_v27  ;;  %v268_v44 = vor.u32 %v267_v38, %v266_v29  ;;  %vm277_vm5 = vcmp.lt.s32.totalorder %v256_v15, 3 }
  0x46   : > { %v271_v46 = vor.u32 %v270_v39, %v269_v31  ;;  %v274_v47 = vor.u32 %v273_v41, %v272_v33  ;;  %v364_v48 = vshll.u32 %v1422_v24, %v361_v20  ;;  %v367_v1 = vshll.u32 %v1423_v26, %v361_v20 }
  0x47   : > { %v279_v49 = vsel %vm275_vm2, %v259_v35, %v262_v42  ;;  %v280_v50 = vsel %vm278_vm4, %v268_v44, 2102212464  ;;  %v283_v59 = vsel %vm275_vm2, %v262_v42, %v265_v43  ;;  %v287_v61 = vsel %vm275_vm2, %v265_v43, %v268_v44 }
  0x48   : > { %v281_v62 = vsel %vm277_vm5, %v265_v43, %v280_v50  ;;  %v284_v63 = vsel %vm278_vm4, %v271_v46, 920167782  ;;  %v288_v0 = vsel %vm278_vm4, %v274_v47, 1326507024  ;;  %v363_v4 = vshrl.u32 %v1422_v24, %v362_v45 }
  0x49   : > { %v285_v2 = vsel %vm277_vm5, %v268_v44, %v284_v63  ;;  %v289_v3 = vsel %vm277_vm5, %v271_v46, %v288_v0  ;;  %v365_v5 = vshrl.u32 %v1423_v26, %v362_v45  ;;  %v282_v6 = vsel %vm276_vm3, %v279_v49, %v281_v62 }
  0x4a   : > { %v286_v7 = vsel %vm276_vm3, %v283_v59, %v285_v2  ;;  %v290_v8 = vsel %vm276_vm3, %v287_v61, %v289_v3  ;;  %v368_v9 = vshrl.u32 %v1424_v28, %v362_v45  ;;  %v370_v23 = vshll.u32 %v1424_v28, %v361_v20 }
  0x4b   : > { %v1581_v10 = vmul.u32.u64.low %v1550_v19, %v290_v8  ;;  %v1582_v11 = vmul.u32.u64.high %v1550_v19, %v290_v8, %v1581_v10  ;;  %v1585_v12 = vmul.u32.u64.low %v1550_v19, %v286_v7  ;;  %v1586_v14 = vmul.u32.u64.high %v1550_v19, %v286_v7, %v1585_v12 }
  0x4c   : > { %v366_v16 = vor.u32 %v365_v5, %v364_v48  ;;  %v369_v17 = vor.u32 %v368_v9, %v367_v1  ;;  %v371_v25 = vshrl.u32 %v1425_v30, %v362_v45  ;;  %v373_v15 = vshll.u32 %v1425_v30, %v361_v20 }
  0x4d   : > { %v374_v27 = vshrl.u32 %v1426_v32, %v362_v45  ;;  %v376_v29 = vshll.u32 %v1426_v32, %v361_v20  ;;  %v377_v31 = vshrl.u32 %v1427_v40, %v362_v45  ;;  %v298_v33 = vmul.u32 %v1550_v19, %v282_v6 }
  0x4e   : > { %v372_v35 = vor.u32 %v371_v25, %v370_v23  ;;  %vm379_vm6 = vcmp.lt.s32.totalorder %v1561_v34, 1  ;;  %vm380_vm7 = vcmp.lt.s32.totalorder %v1561_v34, 2  ;;  %vm300_vm8 = vc.u32 %v1582_v11, %v1585_v12 }
  0x4f   : > { %v301_v36 = vadd.s32 1, %v1586_v14  ;;  %v375_v37 = vor.u32 %v374_v27, %v373_v15  ;;  %vm381_vm9 = vcmp.lt.s32.totalorder %v1561_v34, 3  ;;  %v378_v38 = vor.u32 %v377_v31, %v376_v29 }
  0x50   : > { %vm382_vm10 = vcmp.lt.s32.totalorder %v1561_v34, 4  ;;  %v383_v20 = vsel %vm379_vm6, %v363_v4, %v366_v16  ;;  %v387_v39 = vsel %vm379_vm6, %v366_v16, %v369_v17  ;;  %v391_v43 = vsel %vm379_vm6, %v369_v17, %v372_v35 }
  0x51   : > { %v302_v19 = vsel %vm300_vm8, %v301_v36, %v1586_v14  ;;  %v384_v41 = vsel %vm382_vm10, %v372_v35, 2102212464  ;;  %v388_v42 = vsel %vm382_vm10, %v375_v37, 920167782  ;;  %v392_v47 = vsel %vm382_vm10, %v378_v38, 1326507024 }
  0x52   : > { %v303_v44 = vadd.s32 %v302_v19, %v298_v33  ;;  %v385_v45 = vsel %vm381_vm9, %v369_v17, %v384_v41  ;;  %v389_v46 = vsel %vm381_vm9, %v372_v35, %v388_v42  ;;  %v393_v50 = vsel %vm381_vm9, %v375_v37, %v392_v47 }
  0x53   : > { %v386_v48 = vsel %vm380_vm7, %v383_v20, %v385_v45  ;;  %v390_v49 = vsel %vm380_vm7, %v387_v39, %v389_v46  ;;  %v394_v61 = vsel %vm380_vm7, %v391_v43, %v393_v50  ;;  %v463_v2 = vsel %vm462_vm11, %v1554_v22, 0 }
  0x54   : > { %v304_v59 = vadd.s32 536870912, %v303_v44  ;;  %v1612_v62 = vmul.u32.u64.low %v1552_v21, %v390_v49  ;;  %v1613_v63 = vmul.u32.u64.high %v1552_v21, %v390_v49, %v1612_v62  ;;  %v465_v4 = vand.u32 31, %v463_v2 }
  0x55   : > { %v1617_v0 = vmul.u32.u64.low %v1552_v21, %v394_v61  ;;  %v1618_v1 = vmul.u32.u64.high %v1552_v21, %v394_v61, %v1617_v0  ;;  %v402_v5 = vmul.u32 %v1552_v21, %v386_v48  ;;  %v458_v6 = vand.u32 8388607, %v451_v18 }
  0x56   : > { %v305_v3 = vshrl.u32 %v304_v59, 30  ;;  %v555_v34 = vand.u32 2147483647, %v1547_v13  ;;  %v558_v7 = vand.u32 2139095040, %v1547_v13  ;;  %v405_v9 = vadd.s32 1, %v1613_v63 }
  0x57   : > { %vm404_vm12 = vc.u32 %v1618_v1, %v1612_v62  ;;  %v466_v10 = vsub.s32 32, %v465_v4  ;;  %v459_v16 = vor.u32 8388608, %v458_v6  ;;  %v1638_v15 = vshrl.u32 %v463_v2, 5 }
  0x58   : > { %v306_v8 = vshll.u32 %v305_v3, 30  ;;  %v406_v21 = vsel %vm404_vm12, %v405_v9, %v1613_v63  ;;  %v559_v17 = vshrl.u32 %v558_v7, 23  ;;  %v1635_v23 = vand.u32 8388607, %v555_v34 }
  0x59   : > { %v407_v14 = vadd.s32 %v406_v21, %v402_v5  ;;  %v468_v27 = vshll.u32 %v1422_v24, %v465_v4  ;;  %v471_v29 = vshll.u32 %v1423_v26, %v465_v4  ;;  %v469_v33 = vshrl.u32 %v1423_v26, %v466_v10 }
  0x5a   : > { %v1630_v22 = vsub.s32 %v303_v44, %v306_v8  ;;  %v472_v35 = vshrl.u32 %v1424_v28, %v466_v10  ;;  %v474_v36 = vshll.u32 %v1424_v28, %v465_v4  ;;  %v475_v38 = vshrl.u32 %v1425_v30, %v466_v10 }
  0x5b   : > { %v408_v31 = vadd.s32 536870912, %v407_v14  ;;  %v477_v20 = vshll.u32 %v1425_v30, %v465_v4  ;;  %v478_v39 = vshrl.u32 %v1426_v32, %v466_v10  ;;  %v329_v19 = vsub.s32 4, %v305_v3 }
  0x5c   : > { %v309_v25 = vsub.s32 0, %v1630_v22  ;;  %v480_v42 = vshll.u32 %v1426_v32, %v465_v4  ;;  %v481_v43 = vshrl.u32 %v1427_v40, %v466_v10  ;;  %v299_v45 = vadd.s32 %v1585_v12, %v1582_v11 }
  0x5d   : > { %v1649_v41 = vshrl.u32 %v408_v31, 30  ;;  %v1661_v47 = vshll.u32 %v459_v16, 8  ;;  %v1181_v48 = vadd.s32 4294967169, %v559_v17  ;;  %v467_v50 = vshrl.u32 %v1422_v24, %v466_v10 }
  0x5e   : > { %v1170_v37 = vmin.u32 %v309_v25, %v1630_v22  ;;  %v470_v59 = vor.u32 %v469_v33, %v468_v27  ;;  %v473_v61 = vor.u32 %v472_v35, %v471_v29  ;;  %v476_v0 = vor.u32 %v475_v38, %v474_v36 }
  0x5f   : > { %v410_v49 = vshll.u32 %v1649_v41, 30  ;;  %v479_v2 = vor.u32 %v478_v39, %v477_v20  ;;  %vm483_vm15 = vcmp.lt.s32.totalorder %v1638_v15, 1  ;;  %v330_v57 = vsel %vm245_vm13, %v329_v19, %v305_v3 }
  0x60   : > { %v311_v46 = vclz %v1170_v37  ;;  %v482_v11 = vor.u32 %v481_v43, %v480_v42  ;;  %vm486_vm0 = vcmp.lt.s32.totalorder %v1638_v15, 4  ;;  %vm484_vm2 = vcmp.lt.s32.totalorder %v1638_v15, 2 }
  0x61   : > { %v1668_v4 = vsub.s32 %v407_v14, %v410_v49  ;;  %vm485_vm3 = vcmp.lt.s32.totalorder %v1638_v15, 3  ;;  %v488_v12 = vsel %vm486_vm0, %v476_v0, 2102212464  ;;  %v487_v7 = vsel %vm483_vm15, %v467_v50, %v470_v59 }
  0x62   : > { %v1171_v63 = vadd.s32 4294967294, %v311_v46  ;;  %v491_v3 = vsel %vm483_vm15, %v470_v59, %v473_v61  ;;  %v492_v21 = vsel %vm486_vm0, %v479_v2, 920167782  ;;  %v489_v16 = vsel %vm485_vm3, %v473_v61, %v488_v12 }
  0x63   : > { %v413_v6 = vsub.s32 0, %v1668_v4  ;;  %v493_v17 = vsel %vm485_vm3, %v476_v0, %v492_v21  ;;  %v495_v25 = vsel %vm483_vm15, %v473_v61, %v476_v0  ;;  %v496_v31 = vsel %vm486_vm0, %v482_v11, 1326507024 }
  0x64   : > { %vm1172_vm1 = vcmp.lt.s32.totalorder %v1171_v63, 0  ;;  %v332_v33 = vsel %vm1655_vm14, 0, %v330_v57  ;;  %v563_v36 = vor.u32 8388608, %v1635_v23  ;;  %v565_v37 = vadd.s32 1, %v1181_v48 }
  0x65   : > { %v314_v5 = vsel %vm1172_vm1, 0, %v1171_v63  ;;  %v1174_v14 = vmin.u32 %v413_v6, %v1668_v4  ;;  %v490_v39 = vsel %vm484_vm2, %v487_v7, %v489_v16  ;;  %v497_v19 = vsel %vm485_vm3, %v479_v2, %v496_v31 }
  0x66   : > { %v315_v8 = vsub.s32 32, %v314_v5  ;;  %v316_v9 = vshll.u32 %v1630_v22, %v314_v5  ;;  %v319_v10 = vsub.s32 4294967266, %v314_v5  ;;  %v494_v22 = vsel %vm484_vm2, %v491_v3, %v493_v17 }
  0x67   : > { %v415_v35 = vclz %v1174_v14  ;;  %v498_v43 = vsel %vm484_vm2, %v495_v25, %v497_v19  ;;  %v336_v59 = vadd.s32 3, %v332_v33  ;;  %v403_v61 = vadd.s32 %v1612_v62, %v1618_v1 }
  0x68   : > { %v317_v27 = vshrl.u32 %v299_v45, %v315_v8  ;;  %v320_v29 = vadd.s32 127, %v319_v10  ;;  %v1704_v45 = vmul.u32.u64.low %v1661_v47, %v494_v22  ;;  %v1705_v46 = vmul.u32.u64.high %v1661_v47, %v494_v22, %v1704_v45 }
  0x69   : > { %v1175_v42 = vadd.s32 4294967294, %v415_v35  ;;  %v1709_v48 = vmul.u32.u64.low %v1661_v47, %v498_v43  ;;  %v1710_v50 = vmul.u32.u64.high %v1661_v47, %v498_v43, %v1709_v48  ;;  %vm566_vm5 = vcmp.gt.s32.totalorder %v565_v37, 0 }
  0x6a   : > { %v318_v38 = vor.u32 %v317_v27, %v316_v9  ;;  %v321_v20 = vshll.u32 %v320_v29, 23  ;;  %v506_v0 = vmul.u32 %v1661_v47, %v490_v39  ;;  %v567_v2 = vsel %vm566_vm5, %v565_v37, 0 }
  0x6b   : > { %vm1176_vm4 = vcmp.lt.s32.totalorder %v1175_v42, 0  ;;  %v509_v5 = vadd.s32 1, %v1705_v46  ;;  %vm349_vm6 = vcmp.lt.s32.totalorder %v1526_v52, 0  ;;  %vm508_vm7 = vc.u32 %v1710_v50, %v1704_v45 }
  0x6c   : > { %v322_v49 = vor.u32 4788187, %v321_v20  ;;  %v325_v23 = vcvt.s32.f32 %v318_v38  ;;  %v418_v15 = vsel %vm1176_vm4, 0, %v1175_v42  ;;  %v1720_v62 = vshll.u32 %v563_v36, 8 }
  0x6d   : > { %v419_v57 = vsub.s32 32, %v418_v15  ;;  %v420_v11 = vshll.u32 %v1668_v4, %v418_v15  ;;  %v423_v12 = vsub.s32 4294967266, %v418_v15  ;;  %v510_v3 = vsel %vm508_vm7, %v509_v5, %v1705_v46 }
  0x6e   : > { %v323_v63 = vand.u32 2147483647, %v322_v49  ;;  %v569_v47 = vand.u32 31, %v567_v2  ;;  %v1723_v9 = vand.u32 3, %v336_v59  ;;  %v433_v4 = vsub.s32 4, %v1649_v41 }
  0x6f   : > { %v421_v1 = vshrl.u32 %v403_v61, %v419_v57  ;;  %v424_v7 = vadd.s32 127, %v423_v12  ;;  %v511_v10 = vadd.s32 %v510_v3, %v506_v0  ;;  %vm1728_vm8 = vcmp.le.f32.partialorder %v347_v60, 0.7853982 }
  0x70   : > { %v326_v6 = vmul.f32 %v325_v23, %v323_v63  ;;  %v1732_v17 = vshrl.u32 %v567_v2, 5  ;;  %v570_v25 = vsub.s32 32, %v569_v47  ;;  %v572_v22 = vshll.u32 %v1422_v24, %v569_v47 }
  0x71   : > { %v422_v14 = vor.u32 %v421_v1, %v420_v11  ;;  %v425_v16 = vshll.u32 %v424_v7, 23  ;;  %v512_v29 = vadd.s32 536870912, %v511_v10  ;;  %v575_v31 = vshll.u32 %v1423_v26, %v569_v47 }
  0x72   : > { %v327_v8 = vxor.u32 2147483648, %v326_v6  ;;  %v578_v36 = vshll.u32 %v1424_v28, %v569_v47  ;;  %v573_v38 = vshrl.u32 %v1423_v26, %v570_v25  ;;  %v576_v20 = vshrl.u32 %v1424_v28, %v570_v25 }
  0x73   : > { %v426_v33 = vor.u32 4788187, %v425_v16  ;;  %v429_v35 = vcvt.s32.f32 %v422_v14  ;;  %v513_v37 = vshrl.u32 %v512_v29, 30  ;;  %v579_v19 = vshrl.u32 %v1425_v30, %v570_v25 }
  0x74   : > { %v328_v27 = vsel %vm245_vm13, %v327_v8, %v326_v6  ;;  %v581_v42 = vshll.u32 %v1425_v30, %v569_v47  ;;  %v434_v44 = vsel %vm349_vm6, %v433_v4, %v1649_v41  ;;  %vm453_vm9 = vcmp.lt.s32.totalorder %v1537_v58, 0 }
  0x75   : > { %v331_v60 = vsel %vm1655_vm14, %v1524_v51, %v328_v27  ;;  %v427_v39 = vand.u32 2147483647, %v426_v33  ;;  %v514_v43 = vshll.u32 %v513_v37, 30  ;;  %vm587_vm10 = vcmp.lt.s32.totalorder %v1732_v17, 1 }
  0x76   : > { %1297 = vcosq.f32 %v331_v60  ;;  %v659_v46 = vand.u32 2147483647, %v1528_v53  ;;  %v571_v23 = vshrl.u32 %v1422_v24, %v570_v25  ;;  %v582_v48 = vshrl.u32 %v1426_v32, %v570_v25 }
  0x77   : > { %1299 = vsinq.f32 %v331_v60  ;;  %v430_v49 = vmul.f32 %v429_v35, %v427_v39  ;;  %v584_v59 = vshll.u32 %v1426_v32, %v569_v47  ;;  %v1755_v61 = vsub.s32 %v511_v10, %v514_v43 }
  0x78   : > { %v574_v63 = vor.u32 %v573_v38, %v572_v22  ;;  %v577_v15 = vor.u32 %v576_v20, %v575_v31  ;;  %v585_v41 = vshrl.u32 %v1427_v40, %v570_v25  ;;  %vm342_vm11 = vcmp.eq.s32.totalorder %v1723_v9, 2 }
  0x79   : > { %v431_v0 = vxor.u32 2147483648, %v430_v49  ;;  %v580_v2 = vor.u32 %v579_v19, %v578_v36  ;;  %v583_v57 = vor.u32 %v582_v48, %v581_v42  ;;  %vm590_vm12 = vcmp.lt.s32.totalorder %v1732_v17, 4 }
  0x7a   : > { %vm339_vm13 = vcmp.eq.s32.totalorder %v1723_v9, 0  ;;  %v436_v11 = vsel %vm1728_vm8, 0, %v434_v44  ;;  %vm1765_vm14 = vcmp.le.f32.partialorder %v451_v18, 0.7853982  ;;  %v517_v5 = vsub.s32 0, %v1755_v61 }
  0x7b   : > { %v537_v6 = vsub.s32 4, %v513_v37  ;;  %vm589_vm15 = vcmp.lt.s32.totalorder %v1732_v17, 3  ;;  %vm338_vm0 = vcmp.lt.s32.totalorder %v1723_v9, 2  ;;  %v432_v1 = vsel %vm349_vm6, %v431_v0, %v430_v49 }
  0x7c   : > { %v586_v7 = vor.u32 %v585_v41, %v584_v59  ;;  %v592_v3 = vsel %vm590_vm12, %v580_v2, 2102212464  ;;  %v596_v18 = vsel %vm590_vm12, %v583_v57, 920167782  ;;  %vm335_vm1 = vweird.f32 %v1524_v51 }
  0x7d   : > { %v435_v47 = vsel %vm1728_vm8, %v1526_v52, %v432_v1  ;;  %v1178_v8 = vmin.u32 %v517_v5, %v1755_v61  ;;  %vm588_vm2 = vcmp.lt.s32.totalorder %v1732_v17, 2  ;;  %v595_v4 = vsel %vm587_vm10, %v574_v63, %v577_v15 }
  0x7e   : > { %1301 = vcosq.f32 %v435_v47  ;;  %v591_v10 = vsel %vm587_vm10, %v571_v23, %v574_v63  ;;  %v597_v14 = vsel %vm589_vm15, %v580_v2, %v596_v18  ;;  %v662_v16 = vand.u32 2139095040, %v1528_v53 }
  0x7f   : > { %1303 = vsinq.f32 %v435_v47  ;;  %v519_v25 = vclz %v1178_v8  ;;  %v593_v21 = vsel %vm589_vm15, %v577_v15, %v592_v3  ;;  %v599_v27 = vsel %vm587_vm10, %v577_v15, %v580_v2 }
  0x80   : > { %v440_v29 = vadd.s32 3, %v436_v11  ;;  %v538_v22 = vsel %vm453_vm9, %v537_v6, %v513_v37  ;;  %v598_v31 = vsel %vm588_vm2, %v595_v4, %v597_v14  ;;  %v600_v60 = vsel %vm590_vm12, %v586_v7, 1326507024 }
  0x81   : > { %v1179_v33 = vadd.s32 4294967294, %v519_v25  ;;  %v601_v35 = vsel %vm589_vm15, %v583_v57, %v600_v60  ;;  %v1805_v36 = vmul.u32.u64.low %v1720_v62, %v598_v31  ;;  %v1806_v38 = vmul.u32.u64.high %v1720_v62, %v598_v31, %v1805_v36 }
  0x82   : > { %v507_v39 = vadd.s32 %v1704_v45, %v1710_v50  ;;  %v594_v37 = vsel %vm588_vm2, %v591_v10, %v593_v21  ;;  %v602_v19 = vsel %vm588_vm2, %v599_v27, %v601_v35  ;;  %v663_v42 = vshrl.u32 %v662_v16, 23 }
  0x83   : > { %v1298_v20 = vpop.eup %1297  ;;  %vm1180_vm3 = vcmp.lt.s32.totalorder %v1179_v33, 0  ;;  %v1818_v49 = vmul.u32.u64.low %v1720_v62, %v602_v19  ;;  %v1819_v23 = vmul.u32.u64.high %v1720_v62, %v602_v19, %v1818_v49  ;;  %v540_v45 = vsel %vm1765_vm14, 0, %v538_v22 }
  0x84   : > { %v1300_v44 = vpop.eup %1299  ;;  %v343_v43 = vxor.u32 2147483648, %v1298_v20  ;;  %v522_v59 = vsel %vm1180_vm3, 0, %v1179_v33  ;;  %v1185_v50 = vadd.s32 4294967169, %v663_v42  ;;  %v610_v2 = vmul.u32 %v1720_v62, %v594_v37 }
  0x85   : > { %v340_v48 = vxor.u32 2147483648, %v1300_v44  ;;  %v523_v63 = vsub.s32 32, %v522_v59  ;;  %v524_v15 = vshll.u32 %v1755_v61, %v522_v59  ;;  %v527_v41 = vsub.s32 4294967266, %v522_v59 }
  0x86   : > { %v344_v17 = vsel %vm342_vm11, %v343_v43, %v1300_v44  ;;  %v613_v57 = vadd.s32 1, %v1806_v38  ;;  %v669_v11 = vadd.s32 1, %v1185_v50  ;;  %v441_v6 = vand.u32 3, %v440_v29 }
  0x87   : > { %v341_v0 = vsel %vm339_vm13, %v1298_v20, %v340_v48  ;;  %v525_v1 = vshrl.u32 %v507_v39, %v523_v63  ;;  %v528_v7 = vadd.s32 127, %v527_v41  ;;  %v544_v18 = vadd.s32 3, %v540_v45 }
  0x88   : > { %v345_v5 = vsel %vm338_vm0, %v341_v0, %v344_v17  ;;  %vm612_vm4 = vc.u32 %v1819_v23, %v1805_v36  ;;  %vm670_vm5 = vcmp.gt.s32.totalorder %v669_v11, 0  ;;  %vm439_vm6 = vweird.f32 %v1526_v52 }
  0x89   : > { %v346_v3 = vsel %vm335_vm1, nan, %v345_v5  ;;  %v526_v61 = vor.u32 %v525_v1, %v524_v15  ;;  %v529_v47 = vshll.u32 %v528_v7, 23  ;;  %v614_v62 = vsel %vm612_vm4, %v613_v57, %v1806_v38 }
  0x8a   : > { %v671_v8 = vsel %vm670_vm5, %v669_v11, 0  ;;  %1075 = vst [vmem:[%s1837_s11] sm:$0xff] %v346_v3  ;;  %v615_v9 = vadd.s32 %v614_v62, %v610_v2  ;;  %vm442_vm7 = vcmp.lt.s32.totalorder %v441_v6, 2  ;;  %vm446_vm8 = vcmp.eq.s32.totalorder %v441_v6, 2 }
  0x8b   : > { %v673_v4 = vand.u32 31, %v671_v8  ;;  %v1302_v51 = vpop.eup %1301  ;;  %v530_v10 = vor.u32 4788187, %v529_v47  ;;  %v533_v14 = vcvt.s32.f32 %v526_v61  ;;  %vm443_vm10 = vcmp.eq.s32.totalorder %v441_v6, 0 }
  0x8c   : > { %v1304_v16 = vpop.eup %1303  ;;  %v447_v25 = vxor.u32 2147483648, %v1302_v51  ;;  %v616_v21 = vadd.s32 536870912, %v615_v9  ;;  %v1841_v31 = vand.u32 3, %v544_v18  ;;  %v666_v60 = vand.u32 8388607, %v659_v46 }
  0x8d   : > { %v674_v27 = vsub.s32 32, %v673_v4  ;;  %v444_v29 = vxor.u32 2147483648, %v1304_v16  ;;  %v531_v22 = vand.u32 2147483647, %v530_v10  ;;  %v676_v38 = vshll.u32 %v1422_v24, %v673_v4 }
  0x8e   : > { %v448_v33 = vsel %vm446_vm8, %v447_v25, %v1304_v16  ;;  %v1845_v35 = vshrl.u32 %v616_v21, 30  ;;  %v679_v20 = vshll.u32 %v1423_v26, %v673_v4  ;;  %v682_v42 = vshll.u32 %v1424_v28, %v673_v4 }
  0x8f   : > { %v445_v39 = vsel %vm443_vm10, %v1302_v51, %v444_v29  ;;  %v534_v37 = vmul.f32 %v533_v14, %v531_v22  ;;  %v677_v19 = vshrl.u32 %v1423_v26, %v674_v27  ;;  %v680_v49 = vshrl.u32 %v1424_v28, %v674_v27 }
  0x90   : > { %v449_v44 = vsel %vm442_vm7, %v445_v39, %v448_v33  ;;  %v618_v43 = vshll.u32 %v1845_v35, 30  ;;  %v683_v48 = vshrl.u32 %v1425_v30, %v674_v27  ;;  %v667_v50 = vor.u32 8388608, %v666_v60 }
  0x91   : > { %v450_v59 = vsel %vm439_vm6, nan, %v449_v44  ;;  %v535_v45 = vxor.u32 2147483648, %v534_v37  ;;  %v672_v17 = vshrl.u32 %v671_v8, 5  ;;  %v675_v15 = vshrl.u32 %v1422_v24, %v674_v27 }
  0x92   : > { %v1857_v63 = vsub.s32 %v615_v9, %v618_v43  ;;  %v685_v41 = vshll.u32 %v1425_v30, %v673_v4  ;;  %v686_v0 = vshrl.u32 %v1426_v32, %v674_v27  ;;  %1076 = vst [vmem:[%s1837_s11 + $0x8] sm:$0xff] %v450_v59  ;;  %v678_v57 = vor.u32 %v677_v19, %v676_v38 }
  0x93   : > { %v536_v2 = vsel %vm453_vm9, %v535_v45, %v534_v37  ;;  %v688_v11 = vshll.u32 %v1426_v32, %v673_v4  ;;  %v689_v52 = vshrl.u32 %v1427_v40, %v674_v27  ;;  %v681_v1 = vor.u32 %v680_v49, %v679_v20 }
  0x94   : > { %v539_v5 = vsel %vm1765_vm14, %v1537_v58, %v536_v2  ;;  %v621_v6 = vsub.s32 0, %v1857_v63  ;;  %v684_v7 = vor.u32 %v683_v48, %v682_v42  ;;  %v687_v3 = vor.u32 %v686_v0, %v685_v41 }
  0x95   : > { %1305 = vcosq.f32 %v539_v5  ;;  %v690_v18 = vor.u32 %v689_v52, %v688_v11  ;;  %vm691_vm11 = vcmp.lt.s32.totalorder %v672_v17, 1  ;;  %v707_v47 = vshll.u32 %v667_v50, 8 }
  0x96   : > { %1307 = vsinq.f32 %v539_v5  ;;  %v1182_v61 = vmin.u32 %v621_v6, %v1857_v63  ;;  %v763_v62 = vand.u32 2147483647, %v1530_v54  ;;  %v611_v8 = vadd.s32 %v1805_v36, %v1819_v23 }
  0x97   : > { %vm693_vm9 = vcmp.lt.s32.totalorder %v672_v17, 3  ;;  %vm694_vm12 = vcmp.lt.s32.totalorder %v672_v17, 4  ;;  %v766_v12 = vand.u32 2139095040, %v1530_v54  ;;  %vm692_vm13 = vcmp.lt.s32.totalorder %v672_v17, 2 }
  0x98   : > { %v623_v9 = vclz %v1182_v61  ;;  %v699_v4 = vsel %vm691_vm11, %v678_v57, %v681_v1  ;;  %v703_v51 = vsel %vm691_vm11, %v681_v1, %v684_v7  ;;  %v695_v10 = vsel %vm691_vm11, %v675_v15, %v678_v57 }
  0x99   : > { %v696_v14 = vsel %vm694_vm12, %v684_v7, 2102212464  ;;  %v700_v16 = vsel %vm694_vm12, %v687_v3, 920167782  ;;  %v704_v25 = vsel %vm694_vm12, %v690_v18, 1326507024  ;;  %vm543_vm15 = vweird.f32 %v1537_v58 }
  0x9a   : > { %v1183_v21 = vadd.s32 4294967294, %v623_v9  ;;  %v697_v27 = vsel %vm693_vm9, %v681_v1, %v696_v14  ;;  %v701_v29 = vsel %vm693_vm9, %v684_v7, %v700_v16  ;;  %v705_v22 = vsel %vm693_vm9, %v687_v3, %v704_v25 }
  0x9b   : > { %v641_v60 = vsub.s32 4, %v1845_v35  ;;  %v702_v36 = vsel %vm692_vm13, %v699_v4, %v701_v29  ;;  %v706_v23 = vsel %vm692_vm13, %v703_v51, %v705_v22  ;;  %v767_v33 = vshrl.u32 %v766_v12, 23 }
  0x9c   : > { %vm1184_vm14 = vcmp.lt.s32.totalorder %v1183_v21, 0  ;;  %v698_v38 = vsel %vm692_vm13, %v695_v10, %v697_v27  ;;  %v1880_v20 = vmul.u32.u64.low %v707_v47, %v706_v23  ;;  %v1881_v39 = vmul.u32.u64.high %v707_v47, %v706_v23, %v1880_v20 }
  0x9d   : > { %v626_v37 = vsel %vm1184_vm14, 0, %v1183_v21  ;;  %v1884_v19 = vmul.u32.u64.low %v707_v47, %v702_v36  ;;  %v1885_v42 = vmul.u32.u64.high %v707_v47, %v702_v36, %v1884_v19  ;;  %v1189_v44 = vadd.s32 4294967169, %v767_v33 }
  0x9e   : > { %vm557_vm0 = vcmp.lt.s32.totalorder %v1547_v13, 0  ;;  %v627_v43 = vsub.s32 32, %v626_v37  ;;  %v628_v49 = vshll.u32 %v1857_v63, %v626_v37  ;;  %v631_v48 = vsub.s32 4294967266, %v626_v37 }
  0x9f   : > { %vm546_vm1 = vcmp.lt.s32.totalorder %v1841_v31, 2  ;;  %vm1893_vm2 = vcmp.le.f32.partialorder %v555_v34, 0.7853982  ;;  %v1900_v45 = vsel %vm557_vm0, %v641_v60, %v1845_v35  ;;  %v773_v50 = vadd.s32 1, %v1189_v44 }
  0xa0   : > { %v629_v17 = vshrl.u32 %v611_v8, %v627_v43  ;;  %v632_v15 = vadd.s32 127, %v631_v48  ;;  %v714_v41 = vmul.u32 %v707_v47, %v698_v38  ;;  %vm716_vm3 = vc.u32 %v1881_v39, %v1884_v19 }
  0xa1   : > { %vm547_vm4 = vcmp.eq.s32.totalorder %v1841_v31, 0  ;;  %v717_v63 = vadd.s32 1, %v1885_v42  ;;  %v770_v34 = vand.u32 8388607, %v763_v62  ;;  %vm774_vm5 = vcmp.gt.s32.totalorder %v773_v50, 0 }
  0xa2   : > { %v1306_v0 = vpop.eup %1305  ;;  %vm550_vm6 = vcmp.eq.s32.totalorder %v1841_v31, 2  ;;  %v630_v35 = vor.u32 %v629_v17, %v628_v49  ;;  %v633_v2 = vshll.u32 %v632_v15, 23  ;;  %v775_v57 = vsel %vm774_vm5, %v773_v50, 0 }
  0xa3   : > { %v1308_v11 = vpop.eup %1307  ;;  %v551_v52 = vxor.u32 2147483648, %v1306_v0  ;;  %v644_v5 = vsel %vm1893_vm2, 0, %v1900_v45  ;;  %v718_v6 = vsel %vm716_vm3, %v717_v63, %v1885_v42  ;;  %v777_v1 = vand.u32 31, %v775_v57 }
  0xa4   : > { %v548_v7 = vxor.u32 2147483648, %v1308_v11  ;;  %v634_v3 = vor.u32 4788187, %v633_v2  ;;  %v637_v18 = vcvt.s32.f32 %v630_v35  ;;  %v719_v61 = vadd.s32 %v718_v6, %v714_v41 }
  0xa5   : > { %v552_v47 = vsel %vm550_vm6, %v551_v52, %v1308_v11  ;;  %v771_v8 = vor.u32 8388608, %v770_v34  ;;  %v778_v12 = vsub.s32 32, %v777_v1  ;;  %v870_v9 = vand.u32 2139095040, %v1532_v55 }
  0xa6   : > { %v549_v4 = vsel %vm547_vm4, %v1306_v0, %v548_v7  ;;  %v635_v51 = vand.u32 2147483647, %v634_v3  ;;  %v720_v10 = vadd.s32 536870912, %v719_v61  ;;  %v776_v14 = vshrl.u32 %v775_v57, 5 }
  0xa7   : > { %v553_v16 = vsel %vm546_vm1, %v549_v4, %v552_v47  ;;  %v780_v25 = vshll.u32 %v1422_v24, %v777_v1  ;;  %v781_v21 = vshrl.u32 %v1423_v26, %v778_v12  ;;  %v783_v27 = vshll.u32 %v1423_v26, %v777_v1 }
  0xa8   : > { %v554_v29 = vsel %vm543_vm15, nan, %v553_v16  ;;  %v638_v22 = vmul.f32 %v637_v18, %v635_v51  ;;  %v1923_v60 = vshrl.u32 %v720_v10, 30  ;;  %v784_v36 = vshrl.u32 %v1424_v28, %v778_v12 }
  0xa9   : > { %v786_v23 = vshll.u32 %v1424_v28, %v777_v1  ;;  %v787_v33 = vshrl.u32 %v1425_v30, %v778_v12  ;;  %v789_v31 = vshll.u32 %v1425_v30, %v777_v1  ;;  %v790_v38 = vshrl.u32 %v1426_v32, %v778_v12  ;;  %1077 = vst [vmem:[%s1837_s11 + $0x10] sm:$0xff] %v554_v29 }
  0xaa   : > { %v639_v20 = vxor.u32 2147483648, %v638_v22  ;;  %v722_v37 = vshll.u32 %v1923_v60, 30  ;;  %v1932_v42 = vshll.u32 %v771_v8, 8  ;;  %v871_v58 = vshrl.u32 %v870_v9, 23 }
  0xab   : > { %v779_v44 = vshrl.u32 %v1422_v24, %v778_v12  ;;  %v782_v43 = vor.u32 %v781_v21, %v780_v25  ;;  %v792_v49 = vshll.u32 %v1426_v32, %v777_v1  ;;  %v793_v48 = vshrl.u32 %v1427_v40, %v778_v12 }
  0xac   : > { %v640_v45 = vsel %vm557_vm0, %v639_v20, %v638_v22  ;;  %v1939_v50 = vsub.s32 %v719_v61, %v722_v37  ;;  %v785_v17 = vor.u32 %v784_v36, %v783_v27  ;;  %v791_v15 = vor.u32 %v790_v38, %v789_v31 }
  0xad   : > { %v643_v41 = vsel %vm1893_vm2, %v1547_v13, %v640_v45  ;;  %v788_v63 = vor.u32 %v787_v33, %v786_v23  ;;  %v794_v34 = vor.u32 %v793_v48, %v792_v49  ;;  %vm795_vm7 = vcmp.lt.s32.totalorder %v776_v14, 1 }
  0xae   : > { %1309 = vcosq.f32 %v643_v41  ;;  %v725_v0 = vsub.s32 0, %v1939_v50  ;;  %vm797_vm8 = vcmp.lt.s32.totalorder %v776_v14, 3  ;;  %vm798_vm10 = vcmp.lt.s32.totalorder %v776_v14, 4 }
  0xaf   : > { %1311 = vsinq.f32 %v643_v41  ;;  %vm796_vm11 = vcmp.lt.s32.totalorder %v776_v14, 2  ;;  %v799_v35 = vsel %vm795_vm7, %v779_v44, %v782_v43  ;;  %v800_v2 = vsel %vm798_vm10, %v788_v63, 2102212464 }
  0xb0   : > { %v1186_v57 = vmin.u32 %v725_v0, %v1939_v50  ;;  %v801_v11 = vsel %vm797_vm8, %v785_v17, %v800_v2  ;;  %v803_v52 = vsel %vm795_vm7, %v782_v43, %v785_v17  ;;  %v804_v6 = vsel %vm798_vm10, %v791_v15, 920167782 }
  0xb1   : > { %v805_v59 = vsel %vm797_vm8, %v788_v63, %v804_v6  ;;  %v807_v1 = vsel %vm795_vm7, %v785_v17, %v788_v63  ;;  %v808_v7 = vsel %vm798_vm10, %v794_v34, 1326507024  ;;  %v648_v3 = vadd.s32 3, %v644_v5 }
  0xb2   : > { %v727_v18 = vclz %v1186_v57  ;;  %v802_v61 = vsel %vm796_vm11, %v799_v35, %v801_v11  ;;  %v806_v47 = vsel %vm796_vm11, %v803_v52, %v805_v59  ;;  %v809_v8 = vsel %vm797_vm8, %v791_v15, %v808_v7 }
  0xb3   : > { %v1193_v12 = vadd.s32 4294967169, %v871_v58  ;;  %v810_v4 = vsel %vm796_vm11, %v807_v1, %v809_v8  ;;  %v1953_v51 = vmul.u32.u64.low %v1932_v42, %v806_v47  ;;  %v1954_v10 = vmul.u32.u64.high %v1932_v42, %v806_v47, %v1953_v51 }
  0xb4   : > { %v1187_v9 = vadd.s32 4294967294, %v727_v18  ;;  %v745_v16 = vsub.s32 4, %v1923_v60  ;;  %v1959_v5 = vmul.u32.u64.low %v1932_v42, %v810_v4  ;;  %v1960_v25 = vmul.u32.u64.high %v1932_v42, %v810_v4, %v1959_v5 }
  0xb5   : > { %v877_v21 = vadd.s32 1, %v1193_v12  ;;  %vm647_vm9 = vweird.f32 %v1547_v13  ;;  %vm661_vm12 = vcmp.lt.s32.totalorder %v1528_v53, 0  ;;  %v715_v14 = vadd.s32 %v1884_v19, %v1881_v39 }
  0xb6   : > { %vm1188_vm13 = vcmp.lt.s32.totalorder %v1187_v9, 0  ;;  %v867_v27 = vand.u32 2147483647, %v1532_v55  ;;  %v649_v29 = vand.u32 3, %v648_v3  ;;  %v818_v36 = vmul.u32 %v1932_v42, %v802_v61 }
  0xb7   : > { %v730_v22 = vsel %vm1188_vm13, 0, %v1187_v9  ;;  %vm878_vm14 = vcmp.gt.s32.totalorder %v877_v21, 0  ;;  %v821_v38 = vadd.s32 1, %v1954_v10  ;;  %vm1972_vm15 = vcmp.le.f32.partialorder %v659_v46, 0.7853982 }
  0xb8   : > { %v731_v23 = vsub.s32 32, %v730_v22  ;;  %v732_v33 = vshll.u32 %v1939_v50, %v730_v22  ;;  %v735_v31 = vsub.s32 4294967266, %v730_v22  ;;  %v1979_v39 = vsel %vm661_vm12, %v745_v16, %v1923_v60 }
  0xb9   : > { %vm820_vm0 = vc.u32 %v1960_v25, %v1953_v51  ;;  %v879_v19 = vsel %vm878_vm14, %v877_v21, 0  ;;  %v874_v44 = vand.u32 8388607, %v867_v27  ;;  %vm650_vm1 = vcmp.lt.s32.totalorder %v649_v29, 2 }
  0xba   : > { %v733_v37 = vshrl.u32 %v715_v14, %v731_v23  ;;  %v736_v42 = vadd.s32 127, %v735_v31  ;;  %v822_v58 = vsel %vm820_vm0, %v821_v38, %v1954_v10  ;;  %vm654_vm2 = vcmp.eq.s32.totalorder %v649_v29, 2 }
  0xbb   : > { %v1310_v46 = vpop.eup %1309  ;;  %v823_v43 = vadd.s32 %v822_v58, %v818_v36  ;;  %v881_v49 = vand.u32 31, %v879_v19  ;;  %vm651_vm3 = vcmp.eq.s32.totalorder %v649_v29, 0  ;;  %v748_v15 = vsel %vm1972_vm15, 0, %v1979_v39 }
  0xbc   : > { %v1312_v48 = vpop.eup %1311  ;;  %v655_v60 = vxor.u32 2147483648, %v1310_v46  ;;  %v734_v45 = vor.u32 %v733_v37, %v732_v33  ;;  %v737_v50 = vshll.u32 %v736_v42, 23  ;;  %v875_v2 = vor.u32 8388608, %v874_v44 }
  0xbd   : > { %v652_v17 = vxor.u32 2147483648, %v1312_v48  ;;  %v824_v41 = vadd.s32 536870912, %v823_v43  ;;  %v882_v63 = vsub.s32 32, %v881_v49  ;;  %v884_v52 = vshll.u32 %v1422_v24, %v881_v49 }
  0xbe   : > { %v656_v34 = vsel %vm654_vm2, %v655_v60, %v1312_v48  ;;  %v738_v0 = vor.u32 4788187, %v737_v50  ;;  %v741_v35 = vcvt.s32.f32 %v734_v45  ;;  %v887_v6 = vshll.u32 %v1423_v26, %v881_v49 }
  0xbf   : > { %v653_v57 = vsel %vm651_vm3, %v1310_v46, %v652_v17  ;;  %v1989_v11 = vshrl.u32 %v824_v41, 30  ;;  %v885_v7 = vshrl.u32 %v1423_v26, %v882_v63  ;;  %v888_v3 = vshrl.u32 %v1424_v28, %v882_v63 }
  0xc0   : > { %v657_v59 = vsel %vm650_vm1, %v653_v57, %v656_v34  ;;  %v739_v1 = vand.u32 2147483647, %v738_v0  ;;  %v880_v47 = vshrl.u32 %v879_v19, 5  ;;  %v974_v8 = vand.u32 2139095040, %v1534_v56 }
  0xc1   : > { %v658_v18 = vsel %vm647_vm9, nan, %v657_v59  ;;  %v826_v61 = vshll.u32 %v1989_v11, 30  ;;  %v890_v9 = vshll.u32 %v1424_v28, %v881_v49  ;;  %v891_v4 = vshrl.u32 %v1425_v30, %v882_v63 }
  0xc2   : > { %v742_v12 = vmul.f32 %v741_v35, %v739_v1  ;;  %v893_v10 = vshll.u32 %v1425_v30, %v881_v49  ;;  %1078 = vst [vmem:[%s1837_s11 + $0x18] sm:$0xff] %v658_v18  ;;  %v894_v5 = vshrl.u32 %v1426_v32, %v882_v63  ;;  %v896_v21 = vshll.u32 %v1426_v32, %v881_v49 }
  0xc3   : > { %v827_v16 = vsub.s32 %v823_v43, %v826_v61  ;;  %v2006_v13 = vshll.u32 %v875_v2, 8  ;;  %v886_v29 = vor.u32 %v885_v7, %v884_v52  ;;  %v889_v22 = vor.u32 %v888_v3, %v887_v6 }
  0xc4   : > { %v743_v14 = vxor.u32 2147483648, %v742_v12  ;;  %v897_v36 = vshrl.u32 %v1427_v40, %v882_v63  ;;  %v883_v33 = vshrl.u32 %v1422_v24, %v882_v63  ;;  %v895_v31 = vor.u32 %v894_v5, %v893_v10 }
  0xc5   : > { %v829_v23 = vsub.s32 0, %v827_v16  ;;  %vm899_vm4 = vcmp.lt.s32.totalorder %v880_v47, 1  ;;  %v892_v39 = vor.u32 %v891_v4, %v890_v9  ;;  %vm900_vm5 = vcmp.lt.s32.totalorder %v880_v47, 2 }
  0xc6   : > { %v744_v38 = vsel %vm661_vm12, %v743_v14, %v742_v12  ;;  %vm902_vm6 = vcmp.lt.s32.totalorder %v880_v47, 4  ;;  %v898_v42 = vor.u32 %v897_v36, %v896_v21  ;;  %vm901_vm7 = vcmp.lt.s32.totalorder %v880_v47, 3 }
  0xc7   : > { %v747_v19 = vsel %vm1972_vm15, %v1528_v53, %v744_v38  ;;  %v1190_v37 = vmin.u32 %v829_v23, %v827_v16  ;;  %v904_v58 = vsel %vm902_vm6, %v892_v39, 2102212464  ;;  %v907_v44 = vsel %vm899_vm4, %v886_v29, %v889_v22 }
  0xc8   : > { %1313 = vcosq.f32 %v747_v19  ;;  %v908_v46 = vsel %vm902_vm6, %v895_v31, 920167782  ;;  %v975_v49 = vshrl.u32 %v974_v8, 23  ;;  %v903_v48 = vsel %vm899_vm4, %v883_v33, %v886_v29 }
  0xc9   : > { %1315 = vsinq.f32 %v747_v19  ;;  %v831_v43 = vclz %v1190_v37  ;;  %v905_v60 = vsel %vm901_vm7, %v889_v22, %v904_v58  ;;  %v909_v20 = vsel %vm901_vm7, %v892_v39, %v908_v46 }
  0xca   : > { %v911_v45 = vsel %vm899_vm4, %v889_v22, %v892_v39  ;;  %v752_v50 = vadd.s32 3, %v748_v15  ;;  %v910_v41 = vsel %vm900_vm5, %v907_v44, %v909_v20  ;;  %v912_v63 = vsel %vm902_vm6, %v898_v42, 1326507024 }
  0xcb   : > { %v1191_v17 = vadd.s32 4294967294, %v831_v43  ;;  %v819_v34 = vadd.s32 %v1953_v51, %v1960_v25  ;;  %v913_v0 = vsel %vm901_vm7, %v895_v31, %v912_v63  ;;  %v906_v57 = vsel %vm900_vm5, %v903_v48, %v905_v60 }
  0xcc   : > { %v2028_v35 = vmul.u32.u64.low %v2006_v13, %v910_v41  ;;  %v2029_v2 = vmul.u32.u64.high %v2006_v13, %v910_v41, %v2028_v35  ;;  %v914_v15 = vsel %vm900_vm5, %v911_v45, %v913_v0  ;;  %v1197_v52 = vadd.s32 4294967169, %v975_v49 }
  0xcd   : > { %vm1192_vm8 = vcmp.lt.s32.totalorder %v1191_v17, 0  ;;  %v2035_v59 = vmul.u32.u64.low %v2006_v13, %v914_v15  ;;  %v2036_v1 = vmul.u32.u64.high %v2006_v13, %v914_v15, %v2035_v59  ;;  %v849_v3 = vsub.s32 4, %v1989_v11 }
  0xce   : > { %v834_v6 = vsel %vm1192_vm8, 0, %v1191_v17  ;;  %v922_v18 = vmul.u32 %v2006_v13, %v906_v57  ;;  %v925_v61 = vadd.s32 1, %v2029_v2  ;;  %v981_v8 = vadd.s32 1, %v1197_v52 }
  0xcf   : > { %v835_v7 = vsub.s32 32, %v834_v6  ;;  %v836_v51 = vshll.u32 %v827_v16, %v834_v6  ;;  %v839_v25 = vsub.s32 4294967266, %v834_v6  ;;  %vm751_vm10 = vweird.f32 %v1528_v53 }
  0xd0   : > { %v753_v47 = vand.u32 3, %v752_v50  ;;  %vm765_vm11 = vcmp.lt.s32.totalorder %v1530_v54, 0  ;;  %vm924_vm9 = vc.u32 %v2036_v1, %v2028_v35  ;;  %v971_v4 = vand.u32 2147483647, %v1534_v56 }
  0xd1   : > { %v837_v12 = vshrl.u32 %v819_v34, %v835_v7  ;;  %v840_v9 = vadd.s32 127, %v839_v25  ;;  %vm982_vm12 = vcmp.gt.s32.totalorder %v981_v8, 0  ;;  %v926_v5 = vsel %vm924_vm9, %v925_v61, %v2029_v2 }
  0xd2   : > { %v983_v21 = vsel %vm982_vm12, %v981_v8, 0  ;;  %vm2049_vm13 = vcmp.le.f32.partialorder %v763_v62, 0.7853982  ;;  %v850_v14 = vsel %vm765_vm11, %v849_v3, %v1989_v11  ;;  %v927_v29 = vadd.s32 %v926_v5, %v922_v18 }
  0xd3   : > { %v838_v10 = vor.u32 %v837_v12, %v836_v51  ;;  %v841_v16 = vshll.u32 %v840_v9, 23  ;;  %v985_v22 = vand.u32 31, %v983_v21  ;;  %vm754_vm14 = vcmp.lt.s32.totalorder %v753_v47, 2 }
  0xd4   : > { %vm758_vm15 = vcmp.eq.s32.totalorder %v753_v47, 2  ;;  %vm755_vm0 = vcmp.eq.s32.totalorder %v753_v47, 0  ;;  %v928_v39 = vadd.s32 536870912, %v927_v29  ;;  %v852_v42 = vsel %vm2049_vm13, 0, %v850_v14 }
  0xd5   : > { %v1314_v36 = vpop.eup %1313  ;;  %v842_v23 = vor.u32 4788187, %v841_v16  ;;  %v845_v33 = vcvt.s32.f32 %v838_v10  ;;  %v986_v19 = vsub.s32 32, %v985_v22  ;;  %v978_v11 = vand.u32 8388607, %v971_v4 }
  0xd6   : > { %v1316_v31 = vpop.eup %1315  ;;  %v759_v38 = vxor.u32 2147483648, %v1314_v36  ;;  %v2060_v44 = vshrl.u32 %v928_v39, 30  ;;  %v988_v46 = vshll.u32 %v1422_v24, %v985_v22  ;;  %v991_v43 = vshll.u32 %v1423_v26, %v985_v22 }
  0xd7   : > { %v756_v62 = vxor.u32 2147483648, %v1316_v31  ;;  %v843_v37 = vand.u32 2147483647, %v842_v23  ;;  %v989_v60 = vshrl.u32 %v1423_v26, %v986_v19  ;;  %v994_v20 = vshll.u32 %v1424_v28, %v985_v22 }
  0xd8   : > { %v760_v58 = vsel %vm758_vm15, %v759_v38, %v1316_v31  ;;  %v930_v50 = vshll.u32 %v2060_v44, 30  ;;  %v992_v17 = vshrl.u32 %v1424_v28, %v986_v19  ;;  %v995_v41 = vshrl.u32 %v1425_v30, %v986_v19 }
  0xd9   : > { %v757_v49 = vsel %vm755_vm0, %v1314_v36, %v756_v62  ;;  %v846_v48 = vmul.f32 %v845_v33, %v843_v37  ;;  %v979_v0 = vor.u32 8388608, %v978_v11  ;;  %v984_v2 = vshrl.u32 %v983_v21, 5 }
  0xda   : > { %v761_v45 = vsel %vm754_vm14, %v757_v49, %v760_v58  ;;  %v931_v57 = vsub.s32 %v927_v29, %v930_v50  ;;  %v987_v15 = vshrl.u32 %v1422_v24, %v986_v19  ;;  %v997_v26 = vshll.u32 %v1425_v30, %v985_v22 }
  0xdb   : > { %v762_v63 = vsel %vm751_vm10, nan, %v761_v45  ;;  %v847_v34 = vxor.u32 2147483648, %v846_v48  ;;  %v998_v52 = vshrl.u32 %v1426_v32, %v986_v19  ;;  %v990_v28 = vor.u32 %v989_v60, %v988_v46 }
  0xdc   : > { %1079 = vst [vmem:[%s1837_s11 + $0x20] sm:$0xff] %v762_v63  ;;  %v1000_v59 = vshll.u32 %v1426_v32, %v985_v22  ;;  %v1001_v53 = vshrl.u32 %v1427_v40, %v986_v19  ;;  %v933_v51 = vsub.s32 0, %v931_v57  ;;  %v993_v25 = vor.u32 %v992_v17, %v991_v43 }
  0xdd   : > { %v848_v6 = vsel %vm765_vm11, %v847_v34, %v846_v48  ;;  %v996_v24 = vor.u32 %v995_v41, %v994_v20  ;;  %v999_v30 = vor.u32 %v998_v52, %v997_v26  ;;  %vm1003_vm1 = vcmp.lt.s32.totalorder %v984_v2, 1 }
  0xde   : > { %v851_v7 = vsel %vm2049_vm13, %v1530_v54, %v848_v6  ;;  %v1002_v3 = vor.u32 %v1001_v53, %v1000_v59  ;;  %v1194_v18 = vmin.u32 %v933_v51, %v931_v57  ;;  %v856_v61 = vadd.s32 3, %v852_v42 }
  0xdf   : > { %1317 = vcosq.f32 %v851_v7  ;;  %vm1005_vm2 = vcmp.lt.s32.totalorder %v984_v2, 3  ;;  %vm1006_vm3 = vcmp.lt.s32.totalorder %v984_v2, 4  ;;  %v1019_v8 = vshll.u32 %v979_v0, 8 }
  0xe0   : > { %1319 = vsinq.f32 %v851_v7  ;;  %v935_v32 = vclz %v1194_v18  ;;  %vm1004_vm4 = vcmp.lt.s32.totalorder %v984_v2, 2  ;;  %v1011_v40 = vsel %vm1003_vm1, %v990_v28, %v993_v25 }
  0xe1   : > { %v1015_v47 = vsel %vm1003_vm1, %v993_v25, %v996_v24  ;;  %v1007_v12 = vsel %vm1003_vm1, %v987_v15, %v990_v28  ;;  %v1008_v9 = vsel %vm1006_vm3, %v996_v24, 2102212464  ;;  %v1012_v10 = vsel %vm1006_vm3, %v999_v30, 920167782 }
  0xe2   : > { %v1016_v16 = vsel %vm1006_vm3, %v1002_v3, 1326507024  ;;  %v1195_v5 = vadd.s32 4294967294, %v935_v32  ;;  %v1009_v21 = vsel %vm1005_vm2, %v993_v25, %v1008_v9  ;;  %v1013_v13 = vsel %vm1005_vm2, %v996_v24, %v1012_v10 }
  0xe3   : > { %v1017_v14 = vsel %vm1005_vm2, %v999_v30, %v1016_v16  ;;  %v1014_v29 = vsel %vm1004_vm4, %v1011_v40, %v1013_v13  ;;  %v923_v36 = vadd.s32 %v2028_v35, %v2036_v1  ;;  %v1010_v38 = vsel %vm1004_vm4, %v1007_v12, %v1009_v21 }
  0xe4   : > { %v1018_v22 = vsel %vm1004_vm4, %v1015_v47, %v1017_v14  ;;  %vm1196_vm5 = vcmp.lt.s32.totalorder %v1195_v5, 0  ;;  %v2091_v39 = vmul.u32.u64.low %v1019_v8, %v1014_v29  ;;  %v2092_v19 = vmul.u32.u64.high %v1019_v8, %v1014_v29, %v2091_v39 }
  0xe5   : > { %v2087_v23 = vmul.u32.u64.low %v1019_v8, %v1018_v22  ;;  %v2088_v33 = vmul.u32.u64.high %v1019_v8, %v1018_v22, %v2087_v23  ;;  %v938_v31 = vsel %vm1196_vm5, 0, %v1195_v5  ;;  %v857_v62 = vand.u32 3, %v856_v61 }
  0xe6   : > { %v939_v37 = vsub.s32 32, %v938_v31  ;;  %v940_v42 = vshll.u32 %v931_v57, %v938_v31  ;;  %v943_v11 = vsub.s32 4294967266, %v938_v31  ;;  %v1026_v43 = vmul.u32 %v1019_v8, %v1010_v38 }
  0xe7   : > { %vm1028_vm6 = vc.u32 %v2088_v33, %v2091_v39  ;;  %v1029_v35 = vadd.s32 1, %v2092_v19  ;;  %vm862_vm7 = vcmp.eq.s32.totalorder %v857_v62, 2  ;;  %vm858_vm8 = vcmp.lt.s32.totalorder %v857_v62, 2 }
  0xe8   : > { %v941_v58 = vshrl.u32 %v923_v36, %v939_v37  ;;  %v944_v46 = vadd.s32 127, %v943_v11  ;;  %vm859_vm10 = vcmp.eq.s32.totalorder %v857_v62, 0  ;;  %vm855_vm11 = vweird.f32 %v1530_v54 }
  0xe9   : > { %v1030_v45 = vsel %vm1028_vm6, %v1029_v35, %v2092_v19  ;;  %vm869_vm9 = vcmp.lt.s32.totalorder %v1532_v55, 0  ;;  %v953_v28 = vsub.s32 4, %v2060_v44  ;;  %vm868_vm12 = vcmp.le.f32.partialorder %v867_v27, 0.7853982 }
  0xea   : > { %v942_v49 = vor.u32 %v941_v58, %v940_v42  ;;  %v945_v48 = vshll.u32 %v944_v46, 23  ;;  %v1031_v63 = vadd.s32 %v1030_v45, %v1026_v43  ;;  %v1027_v32 = vadd.s32 %v2091_v39, %v2088_v33 }
  0xeb   : > { %v954_v51 = vsel %vm869_vm9, %v953_v28, %v2060_v44  ;;  %vm959_vm1 = vweird.f32 %v1532_v55  ;;  %vm973_vm2 = vcmp.lt.s32.totalorder %v1534_v56, 0  ;;  %vm972_vm3 = vcmp.le.f32.partialorder %v971_v4, 0.7853982 }
  0xec   : > { %v1318_v1 = vpop.eup %1317  ;;  %v946_v17 = vor.u32 4788187, %v945_v48  ;;  %v949_v41 = vcvt.s32.f32 %v942_v49  ;;  %v1032_v57 = vadd.s32 536870912, %v1031_v63  ;;  %v956_v30 = vsel %vm868_vm12, 0, %v954_v51 }
  0xed   : > { %v1320_v60 = vpop.eup %1319  ;;  %v863_v20 = vxor.u32 2147483648, %v1318_v1  ;;  %v960_v61 = vadd.s32 3, %v956_v30 }
  0xee   : > { %v860_v50 = vxor.u32 2147483648, %v1320_v60  ;;  %v947_v2 = vand.u32 2147483647, %v946_v17  ;;  %v1033_v6 = vshrl.u32 %v1032_v57, 30 }
  0xef   : > { %v864_v34 = vsel %vm862_vm7, %v863_v20, %v1320_v60  ;;  %v961_v27 = vand.u32 3, %v960_v61  ;;  %vm1063_vm7 = vweird.f32 %v1534_v56 }
  0xf0   : > { %v861_v0 = vsel %vm859_vm10, %v1318_v1, %v860_v50  ;;  %v950_v52 = vmul.f32 %v949_v41, %v947_v2  ;;  %v1034_v53 = vshll.u32 %v1033_v6, 30  ;;  %v1057_v62 = vsub.s32 4, %v1033_v6 }
  0xf1   : > { %v865_v15 = vsel %vm858_vm8, %v861_v0, %v864_v34  ;;  %vm966_vm14 = vcmp.eq.s32.totalorder %v961_v27, 2  ;;  %vm963_vm15 = vcmp.eq.s32.totalorder %v961_v27, 0  ;;  %vm962_vm0 = vcmp.lt.s32.totalorder %v961_v27, 2 }
  0xf2   : > { %v866_v26 = vsel %vm855_vm11, nan, %v865_v15  ;;  %v951_v59 = vxor.u32 2147483648, %v950_v52  ;;  %v1035_v54 = vsub.s32 %v1031_v63, %v1034_v53 }
  0xf3   : > { %1080 = vst [vmem:[%s1837_s11 + $0x28] sm:$0xff] %v866_v26 }
  0xf4   : > { %v952_v7 = vsel %vm869_vm9, %v951_v59, %v950_v52  ;;  %v1037_v24 = vsub.s32 0, %v1035_v54 }
  0xf5   : > { %v955_v25 = vsel %vm868_vm12, %v1532_v55, %v952_v7  ;;  %v1058_v55 = vsel %vm973_vm2, %v1057_v62, %v1033_v6 }
  0xf6   : > { %1321 = vcosq.f32 %v955_v25  ;;  %v1198_v3 = vmin.u32 %v1037_v24, %v1035_v54  ;;  %v1060_v58 = vsel %vm972_vm3, 0, %v1058_v55 }
  0xf7   : > { %1323 = vsinq.f32 %v955_v25  ;;  %v1064_v46 = vadd.s32 3, %v1060_v58 }
  0xf8   : > { %v1039_v18 = vclz %v1198_v3 }
  0xf9   : > { %v1065_v43 = vand.u32 3, %v1064_v46 }
  0xfa   : > { %v1199_v8 = vadd.s32 4294967294, %v1039_v18 }
  0xfb   : > { %vm1070_vm4 = vcmp.eq.s32.totalorder %v1065_v43, 2  ;;  %vm1067_vm5 = vcmp.eq.s32.totalorder %v1065_v43, 0  ;;  %vm1066_vm6 = vcmp.lt.s32.totalorder %v1065_v43, 2 }
  0xfc   : > { %vm1200_vm13 = vcmp.lt.s32.totalorder %v1199_v8, 0 }
  0xfd   : > { %v1042_v40 = vsel %vm1200_vm13, 0, %v1199_v8 }
  0xfe   : > { %v1043_v47 = vsub.s32 32, %v1042_v40  ;;  %v1044_v12 = vshll.u32 %v1035_v54, %v1042_v40  ;;  %v1047_v9 = vsub.s32 4294967266, %v1042_v40 }
 0x100   : > { %v1045_v10 = vshrl.u32 %v1027_v32, %v1043_v47  ;;  %v1048_v44 = vadd.s32 127, %v1047_v9 }
 0x102   : > { %v1046_v13 = vor.u32 %v1045_v10, %v1044_v12  ;;  %v1049_v14 = vshll.u32 %v1048_v44, 23 }
 0x103   : > { %v1322_v16 = vpop.eup %1321 }
 0x104   : > { %v1324_v5 = vpop.eup %1323  ;;  %v967_v21 = vxor.u32 2147483648, %v1322_v16  ;;  %v1050_v36 = vor.u32 4788187, %v1049_v14  ;;  %v1053_v23 = vcvt.s32.f32 %v1046_v13 }
 0x105   : > { %v964_v29 = vxor.u32 2147483648, %v1324_v5 }
 0x106   : > { %v968_v22 = vsel %vm966_vm14, %v967_v21, %v1324_v5  ;;  %v1051_v38 = vand.u32 2147483647, %v1050_v36 }
 0x107   : > { %v965_v33 = vsel %vm963_vm15, %v1322_v16, %v964_v29 }
 0x108   : > { %v969_v31 = vsel %vm962_vm0, %v965_v33, %v968_v22  ;;  %v1054_v19 = vmul.f32 %v1053_v23, %v1051_v38 }
 0x109   : > { %v970_v39 = vsel %vm959_vm1, nan, %v969_v31 }
 0x10a   : > { %1081 = vst [vmem:[%s1837_s11 + $0x30] sm:$0xff] %v970_v39  ;;  %v1055_v37 = vxor.u32 2147483648, %v1054_v19 }
 0x10c   : > { %v1056_v42 = vsel %vm973_vm2, %v1055_v37, %v1054_v19 }
 0x10d   : > { %v1059_v11 = vsel %vm972_vm3, %v1534_v56, %v1056_v42 }
 0x10e   : > { %1325 = vcosq.f32 %v1059_v11 }
 0x10f   : > { %1327 = vsinq.f32 %v1059_v11 }
 0x11b   : > { %v1326_v35 = vpop.eup %1325 }
 0x11c   : > { %v1328_v1 = vpop.eup %1327  ;;  %v1071_v49 = vxor.u32 2147483648, %v1326_v35 }
 0x11d   : > { %v1068_v4 = vxor.u32 2147483648, %v1328_v1 }
 0x11e   : > { %v1072_v48 = vsel %vm1070_vm4, %v1071_v49, %v1328_v1 }
 0x11f   : > { %v1069_v60 = vsel %vm1067_vm5, %v1326_v35, %v1068_v4 }
 0x120   : > { %v1073_v20 = vsel %vm1066_vm6, %v1069_v60, %v1072_v48 }
 0x121   : > { %v1074_v45 = vsel %vm1063_vm7, nan, %v1073_v20 }
 0x122   : > { %1082 = vst [vmem:[%s1837_s11 + $0x38] sm:$0xff] %v1074_v45 }
 0x123   : > { %1368 = shalt.err (!%p1365_p1)
}
 0x124   : > { %s1369_s30 = scalar_lea.hbm %s2118_s25, 1024  ;;  %s1373_s6 = scalar_lea.hbm %s2168_s3, 2048 }
 0x125   : > { %p1370_p2 = scmp.ne.s32.totalorder %s2118_s25, %s1369_s30  ;;  %p1374_p7 = scmp.lt.s32.totalorder %s2118_s25, %s2168_s3 }
 0x126   : > { %p1375_p8 = scmp.lt.s32.totalorder %s1373_s6, %s1369_s30 }
 0x127   : > { %p1371_p3 = pnand %p1370_p2, %p1489_p5 }
 0x128   : > { %p1376_p9 = por %p1375_p8, %p1374_p7 }
 0x129   : > { %p1372_p4 = pneg %p1371_p3 }
 0x12b   : > { %p1377_p10 = pnand %p1376_p9, %p1372_p4 }
 0x12d   : > { %1380 = shalt.err (!%p1377_p10)
}
 0x12e   : > { %s1429_s9 = smov 128   ;;  %s1430_s10 = smov 8  }
 0x12f   : > { %1243 = dma.vmem_to_hbm [thread:$0]  (%p1489_p5), %s2120_s19, 1024, %s2118_s25, %s2125_s16, %s1429_s9, %s1429_s9, %s1430_s10  }
 0x130 PF: > { %p1255_p11 = scmp.ge.s32.totalorder %s1419_s15, 2  ;;  %s1112_s11 = sand.u32 1, %s1407_s12  }
 0x131   : > { %s1113_s17 = scalar_lea.sflag [#allocation4], %s1112_s11 }
 0x132   : > { %p1250_p12 = pnand %p1255_p11, %p1493_p6 }
 0x134   : > { %p1251_p13 = pneg %p1250_p12 }
 0x136   : > { %1402 = dma.done.wait (%p1251_p13), %s1113_s17, 1024  }
 0x137   : > { %1404 = vsyncadd (%p1251_p13), %s1113_s17, 4294966272  ;;  %p14_p0 = scmp.ge.s32.totalorder %s1476_s18, 4   ;;  %s2184_s12 = smov %s1411_s13 }
 0x138   : > { %s2185_s13 = smov %s1415_s14  ;;  %s2186_s14 = smov %s1487_s21 }
 0x139   : > { %s2187_s15 = smov %s1476_s18  ;;  %16 = sbr.rel (!%p14_p0) target bundleno = 4 (0x4), region = 69 }
 0x13e   :  { %1118 = vsyncpa [#allocation3], 1 }
 0x13f   :  { %1120 = vsyncpa [#allocation3 + $0x1], 1 }
 0x140   :  { %1121 = vsyncpa [#allocation4], 1 }
 0x141   :  { %1123 = vsyncpa [#allocation4 + $0x1], 1 }

</bundles_post_ra>
